<compile_context>
chip_gen: v5e
topology: v5e:2x2
jax: 0.10.0
libtpu: 0.0.40
codegen_flags: <defaults>
</compile_context>

<pallas_src>
import functools

import jax
import jax.numpy as jnp
from jax import lax
from jax.experimental import pallas as pl
from jax.experimental.pallas import tpu as pltpu

_LANES = 128          # vreg lane width
_MIN_GRID_STEPS = 2   # v7x has 2 TensorCores/chip sharded via parallel grid axes


def make_pe(num_channels: int, max_height: int, max_width: int,
            dtype=jnp.float32) -> jax.Array:
    """Builds the 2D sinusoidal positional-encoding buffer, shape (1, C, H, W)."""
    pos_h = jnp.arange(max_height, dtype=dtype)[:, None]             # (H, 1)
    pos_w = jnp.arange(max_width, dtype=dtype)[:, None]              # (W, 1)
    den = jnp.power(10000.0,
                    jnp.arange(0, num_channels // 2, 2, dtype=dtype) / num_channels)
    d = den.shape[0]

    sin_w = jnp.sin(pos_w / den)                                      # (W, D)
    cos_w = jnp.cos(pos_w / den)                                      # (W, D)
    sin_h = jnp.sin(pos_h / den)                                      # (H, D)
    cos_h = jnp.cos(pos_h / den)                                      # (H, D)

    pe = jnp.zeros((1, max_height, max_width, num_channels), dtype=dtype)  # NHWC
    pe = pe.at[0, :, :, 0:num_channels // 2:2].set(
        jnp.broadcast_to(sin_w[None, :, :], (max_height, max_width, d)))
    pe = pe.at[0, :, :, 1:num_channels // 2:2].set(
        jnp.broadcast_to(cos_w[None, :, :], (max_height, max_width, d)))
    pe = pe.at[0, :, :, num_channels // 2::2].set(
        jnp.broadcast_to(sin_h[:, None, :], (max_height, max_width, d)))
    pe = pe.at[0, :, :, num_channels // 2 + 1::2].set(
        jnp.broadcast_to(cos_h[:, None, :], (max_height, max_width, d)))
    # permute(0, 3, 1, 2) -> NCHW, like the PyTorch buffer.
    return jnp.transpose(pe, (0, 3, 1, 2))


def prepare_pe(pe: jax.Array, height: int, width: int, dtype) -> jax.Array:
    """Hoist the per-call slice + cast out of the hot path: do it ONCE.

    The strided slice and dtype cast are each a full PE-sized HBM pass in XLA;
    call this once (or jit it with a constant pe) and pass the result to
    positional_encoding_2d on every forward.
    """
    if pe.shape[2] != height or pe.shape[3] != width:
        pe = pe[:, :, :height, :width]
    if pe.dtype != dtype:
        # TODO(synk): torch would promote a bf16 x + f32 pe add to f32; here pe
        # is cast down to x.dtype to keep the kernel single-dtype / lane-dense.
        pe = pe.astype(dtype)
    return pe


def _hw_budget():
    """(target_tile_bytes, vmem_limit_bytes) tuned per TPU generation."""
    try:
        kind = jax.devices()[0].device_kind.lower()
    except Exception:
        kind = ""
    if "v5" in kind or "v6" in kind:
        # 128 MiB physical VMEM: ~8 MiB tiles, raise the scoped-VMEM cap.
        # (2 bufs x (x + out + pe) blocks ~= 40-48 MiB, well under the limit.)
        return 8 * 1024 * 1024, 64 * 1024 * 1024
    # v7x has only 64 MiB VMEM/TC (and unknown devices / interpret mode):
    # 4 MiB tiles are already past the roofline knee; keep headroom for Mosaic.
    return 4 * 1024 * 1024, 48 * 1024 * 1024


def _largest_divisor_leq(n: int, cap: int) -> int:
    cap = max(1, min(n, cap))
    for d in range(cap, 0, -1):
        if n % d == 0:
            return d
    return 1


def _plan_blocks(n: int, rows: int, itemsize: int, target_tile_bytes: int):
    """Choose (batch_block, tile_rows) for blocks of shape (nb, tile_rows, 128).

    - tile_rows is either the full row extent or a multiple of the dtype's
      sublane packing (8 f32 / 16 bf16 / 32 int8-fp8) -> unmasked-store fast path.
    - Batch is blocked too (nb | n) so small tensors become one or two big
      grid steps instead of many tiny ones.
    - Guarantees at least _MIN_GRID_STEPS total steps so both v7x TensorCores
      get work even at batch 1.
    """
    sub = max(8, 32 // itemsize)               # dtype-aware sublane multiple
    lane_row_bytes = _LANES * itemsize
    per_batch_bytes = rows * lane_row_bytes

    # Batch blocking: pack as many batch elements per block as the budget allows.
    nb = _largest_divisor_leq(n, max(1, target_tile_bytes // max(per_batch_bytes, 1)))

    # Row tiling within the remaining budget.
    row_cap = max(sub, target_tile_bytes // (nb * lane_row_bytes))
    tile_rows = min(rows, (row_cap // sub) * sub)
    if tile_rows <= 0:
        tile_rows = min(rows, sub)
    if tile_rows < rows:
        tile_rows = max(sub, (tile_rows // sub) * sub)   # partial tiles need sub-multiple

    def steps(nb_, tr_):
        return (n // nb_) * (-(-rows // tr_))

    while steps(nb, tile_rows) < _MIN_GRID_STEPS:
        if nb > 1:                                        # first split the batch block
            nb = _largest_divisor_leq(n, nb - 1)
            continue
        if rows > sub and tile_rows > sub:                # then split the row tile
            half = (tile_rows + 1) // 2
            new_tr = max(sub, ((half + sub - 1) // sub) * sub)
            if new_tr < tile_rows:
                tile_rows = new_tr
                continue
        break                                             # tensor too small to split further
    return nb, tile_rows


def _pe_kernel(seed_ref, x_ref, pe_ref, o_ref, *, keep_prob: float,
               nb: int, tile_rows: int, total_rows: int):
    """One grid step = one (row-tile, batch-block) pair; blocks (nb, tile_rows, 128)."""
    y = x_ref[...] + pe_ref[...]                           # pe broadcasts over nb

    if keep_prob < 1.0:   # training-mode inverted dropout (trace-time flag)
        shape = y.shape
        # Global element index (tiling-invariant), then a lowbias32 integer mix.
        bi = lax.broadcasted_iota(jnp.int32, shape, 0) + pl.program_id(1) * nb
        ri = lax.broadcasted_iota(jnp.int32, shape, 1) + pl.program_id(0) * tile_rows
        li = lax.broadcasted_iota(jnp.int32, shape, 2)
        gidx = (bi * total_rows + ri) * _LANES + li        # wraps for huge tensors: fine for hashing
        seed32 = seed_ref[0].astype(jnp.uint32) * jnp.uint32(0x9E3779B9)
        h = gidx.astype(jnp.uint32) ^ seed32
        h = h ^ (h >> jnp.uint32(16))
        h = h * jnp.uint32(0x7FEB352D)
        h = h ^ (h >> jnp.uint32(15))
        h = h * jnp.uint32(0x846CA68B)
        h = h ^ (h >> jnp.uint32(16))
        # Top 24 bits -> uniform float in [0, 1); compare in f32 (signed-safe).
        u = (h >> jnp.uint32(8)).astype(jnp.int32).astype(jnp.float32) * (1.0 / (1 << 24))
        y = jnp.where(u < keep_prob, y * (1.0 / keep_prob), jnp.zeros_like(y))

    o_ref[...] = y.astype(o_ref.dtype)


def positional_encoding_2d(x: jax.Array, pe: jax.Array, *,
                           dropout_p: float = 0.1,
                           training: bool = False,
                           seed: int = 0,
                           target_tile_bytes: int | None = None,
                           vmem_limit_bytes: int | None = None) -> jax.Array:
    """Forward pass of PositionalEncoding2D.  x: (N, C, H, W), pe: (1, C, >=H, >=W)."""
    n, c, h, w = x.shape
    pe = prepare_pe(pe, h, w, x.dtype)          # no-op if the caller pre-sliced/cast it
    keep_prob = 1.0 if not training else float(1.0 - float(dropout_p))

    if target_tile_bytes is None or vmem_limit_bytes is None:
        tb, vb = _hw_budget()
        target_tile_bytes = target_tile_bytes or tb
        vmem_limit_bytes = vmem_limit_bytes or vb

    flat_len = c * h * w
    itemsize = x.dtype.itemsize

    # Lane-dense flat view.  Pad ONLY in the rare flat_len % 128 != 0 case;
    # partial row-tiles at the edge are handled by Pallas masking instead.
    pad = (-flat_len) % _LANES
    padded_len = flat_len + pad
    rows = padded_len // _LANES

    x_flat = x.reshape(n, flat_len)
    pe_flat = pe.reshape(1, flat_len)
    if pad:
        x_flat = jnp.pad(x_flat, ((0, 0), (0, pad)))
        pe_flat = jnp.pad(pe_flat, ((0, 0), (0, pad)))
    x_3d = x_flat.reshape(n, rows, _LANES)
    pe_3d = pe_flat.reshape(1, rows, _LANES)

    nb, tile_rows = _plan_blocks(n, rows, itemsize, target_tile_bytes)
    num_tiles = pl.cdiv(rows, tile_rows)
    n_blocks = n // nb

    seed_arr = jnp.asarray([seed], dtype=jnp.int32)
    kernel = functools.partial(_pe_kernel, keep_prob=keep_prob,
                               nb=nb, tile_rows=tile_rows, total_rows=rows)

    out_3d = pl.pallas_call(
        kernel,
        out_shape=jax.ShapeDtypeStruct((n, rows, _LANES), x.dtype),
        grid_spec=pltpu.PrefetchScalarGridSpec(
            num_scalar_prefetch=1,                 # dropout seed lives in SMEM
            # Tile axis outermost, batch innermost: the pe tile's block index is
            # constant across the batch sweep, so pe is fetched once per tile.
            grid=(num_tiles, n_blocks),
            in_specs=[
                pl.BlockSpec((nb, tile_rows, _LANES), lambda t, b, seed: (b, t, 0)),
                pl.BlockSpec((1, tile_rows, _LANES), lambda t, b, seed: (0, t, 0)),
            ],
            out_specs=pl.BlockSpec((nb, tile_rows, _LANES), lambda t, b, seed: (b, t, 0)),
        ),
        # x (input index 1, after the seed) aliases the output: no extra output
        # allocation, and XLA can elide the copy when x is donated by the caller.
        input_output_aliases={1: 0},
        compiler_params=pltpu.CompilerParams(
            dimension_semantics=("parallel", "parallel"),
            vmem_limit_bytes=vmem_limit_bytes,
        ),
    )(seed_arr, x_3d, pe_3d)

    out = out_3d.reshape(n, padded_len)
    if pad:
        out = out[:, :flat_len]
    return out.reshape(n, c, h, w)


if __name__ == "__main__":
    # Small shapes consistent with the module's forward (NCHW).
    N, C, H, W = 2, 4, 16, 16
    MAX_H, MAX_W = 32, 32

    key = jax.random.PRNGKey(0)
    x = jax.random.normal(key, (N, C, H, W), dtype=jnp.float32)

    pe_full = make_pe(C, MAX_H, MAX_W)            # (1, C, maxH, maxW), like the torch buffer
    pe = prepare_pe(pe_full, H, W, x.dtype)       # hoisted slice+cast: once, not per forward
    ref = x + pe

    # Eval-mode forward (dropout = identity), matches module.eval() exactly.
    out = positional_encoding_2d(x, pe, dropout_p=0.1, training=False)
    out = jax.block_until_ready(out)
    assert out.shape == (N, C, H, W)
    assert jnp.allclose(out, ref, atol=1e-6), "eval-mode mismatch vs reference"

    # Train-mode forward: correct inverted dropout, checked structurally.
    # TODO(synk): the dropout mask is a deterministic counter-based hash, not
    # torch's RNG stream, so it is not bit-identical to nn.Dropout's mask.
    out_tr = positional_encoding_2d(x, pe, dropout_p=0.1, training=True, seed=123)
    out_tr = jax.block_until_ready(out_tr)
    keep = 1.0 - 0.1
    is_zero = jnp.isclose(out_tr, 0.0, atol=1e-6)
    is_scaled = jnp.isclose(out_tr, ref / keep, rtol=1e-5, atol=1e-5)
    assert bool(jnp.all(is_zero | is_scaled)), "train-mode dropout structure wrong"
    drop_frac = float(jnp.mean(jnp.logical_and(is_zero, jnp.logical_not(is_scaled))))
    assert drop_frac <= 0.35, f"train-mode drop fraction implausible: {drop_frac}"

    print("KERNEL_OK")
</pallas_src>

<mosaic_0001>
module attributes {stable_mosaic.version = 11 : i64} {
  func.func @_pe_kernel(%arg0: i32, %arg1: i32, %arg2: memref<1xi32, #tpu.memory_space<smem>>, %arg3: memref<1x8x128xf32, #tpu.memory_space<vmem>>, %arg4: memref<1x8x128xf32, #tpu.memory_space<vmem>>, %arg5: memref<1x8x128xf32, #tpu.memory_space<vmem>>) attributes {dimension_semantics = [#tpu.dimension_semantics<parallel>, #tpu.dimension_semantics<parallel>], iteration_bounds = array<i64: 1, 2>, scalar_prefetch = 1 : i64, scratch_operands = 0 : i64, tpu.core_type = #tpu.core_type<tc>, window_params = [{transform_indices = @transform_0, window_bounds = array<i64: 1, 8, 128>}, {transform_indices = @transform_1, window_bounds = array<i64: 1, 8, 128>}, {transform_indices = @transform_2, window_bounds = array<i64: 1, 8, 128>}]} {
    %c0 = arith.constant 0 : index
    %c0_0 = arith.constant 0 : index
    %c0_1 = arith.constant 0 : index
    %0 = vector.load %arg3[%c0, %c0_0, %c0_1] : memref<1x8x128xf32, #tpu.memory_space<vmem>>, vector<1x8x128xf32>
    %c0_2 = arith.constant 0 : index
    %c0_3 = arith.constant 0 : index
    %c0_4 = arith.constant 0 : index
    %1 = vector.load %arg4[%c0_2, %c0_3, %c0_4] : memref<1x8x128xf32, #tpu.memory_space<vmem>>, vector<1x8x128xf32>
    %2 = arith.addf %0, %1 : vector<1x8x128xf32>
    %c0_5 = arith.constant 0 : index
    %c0_6 = arith.constant 0 : index
    %c0_7 = arith.constant 0 : index
    %3 = vector.load %arg5[%c0_5, %c0_6, %c0_7] : memref<1x8x128xf32, #tpu.memory_space<vmem>>, vector<1x8x128xf32>
    tpu.vector_store %arg5[%c0_5, %c0_6, %c0_7], %2 {strides = array<i32>} : memref<1x8x128xf32, #tpu.memory_space<vmem>>, vector<1x8x128xf32>,
    return
  }
  func.func @transform_0(%arg0: i32, %arg1: i32, %arg2: memref<1xi32, #tpu.memory_space<smem>>) -> (i32, i32, i32) {
    %c0_i32 = arith.constant 0 : i32
    %c0_i32_0 = arith.constant 0 : i32
    return %arg1, %arg0, %c0_i32 : i32, i32, i32
  }
  func.func @transform_1(%arg0: i32, %arg1: i32, %arg2: memref<1xi32, #tpu.memory_space<smem>>) -> (i32, i32, i32) {
    %c0_i32 = arith.constant 0 : i32
    %c0_i32_0 = arith.constant 0 : i32
    %c0_i32_1 = arith.constant 0 : i32
    return %c0_i32, %arg0, %c0_i32_0 : i32, i32, i32
  }
  func.func @transform_2(%arg0: i32, %arg1: i32, %arg2: memref<1xi32, #tpu.memory_space<smem>>) -> (i32, i32, i32) {
    %c0_i32 = arith.constant 0 : i32
    %c0_i32_0 = arith.constant 0 : i32
    return %arg1, %arg0, %c0_i32 : i32, i32, i32
  }
}

</mosaic_0001>

<bundles_post_ra>
// kernel: tpu_custom_call.1
= control target key start
LH: loop header
LB: loop body
LE: loop exit
PB: predicated region body
PF: predicated region fallthrough
CT: control target
= control target key end

     0   :  { %9 = vsyncpa [#allocation5], 0  ;;  %s646_s0 = inlined_call_operand.<no memory space> [shape: s32[1], index: 0, kind: input, shape index: {}]   ;;  %s647_s1 = inlined_call_operand.hbm [shape: f32[2,8,128], index: 1, kind: input, shape index: {}, may-alias: {1,3}]   ;;  %s648_s2 = inlined_call_operand.vmem [shape: f32[1,8,128], index: 2, kind: input, shape index: {}]   ;;  %s649_s3 = inlined_call_operand.hbm [shape: f32[2,8,128], index: 3, kind: output, shape index: {}, may-alias: {1,3}]  }
   0x1   :  { %11 = vsyncpa [#allocation5 + $0x1], 0 }
   0x2   :  { %12 = vsyncpa [#allocation6], 0 }
   0x3   :  { %14 = vsyncpa [#allocation6 + $0x1], 0  ;;  %s523_s12 = smov 0   ;;  %s525_s13 = smov 0  }
   0x4   :  { %s527_s14 = smov 0   ;;  %s529_s0 = smov 0  }
   0x5   :  { %s531_s15 = smov 0   ;;  %s533_s16 = smov 0  }
   0x6 LB: > { %s313_s17 = sadd.s32 4294967295, %s501_s16   ;;  %s314_s18 = sadd.s32 4294967294, %s501_s16   ;;  %s501_s16 = sphi %s533_s16, %s20_s16   ;;  %s497_s15 = sphi %s531_s15, %s658_s15   ;;  %s493_s0 = sphi %s529_s0, %s657_s0   ;;  %s489_s14 = sphi %s527_s14, %s656_s14   ;;  %s485_s13 = sphi %s525_s13, %s655_s13   ;;  %s481_s12 = sphi %s523_s12, %s654_s12  }
   0x7   : > { %s29_s19 = sadd.s32 1, %s497_s15  ;;  %s41_s20 = sadd.s32 1, %s489_s14 }
   0x8   : > { %p30_p0 = scmp.ge.s32.totalorder %s29_s19, 2  ;;  %p48_p1 = scmp.ne.s32.totalorder %s489_s14, %s485_s13 }
   0x9   : > { %p49_p2 = scmp.eq.s32.totalorder %s501_s16, 0  ;;  %p54_p3 = scmp.ne.s32.totalorder %s485_s13, %s481_s12 }
   0xa   : > { %s660_s19 = smov (%p30_p0, %s29_s19), 0  ;;  %p55_p5 = scmp.eq.s32.totalorder %s313_s17, 0 }
   0xb   : > { %p564_p4 = por %p49_p2, %p48_p1  ;;  %s36_s22 = ssub.s32 %s497_s15, %s660_s19 }
   0xc   : > { %p106_p6 = scmp.eq.s32.totalorder %s313_s17, 1  ;;  %p39_p7 = scmp.eq.s32.totalorder %s36_s22, 0 }
   0xd   : > { %p570_p8 = por %p55_p5, %p54_p3  ;;  %p112_p10 = scmp.eq.s32.totalorder %s314_s18, 1 }
   0xe   : > { %p574_p9 = por %p106_p6, %p48_p1  ;;  %p317_p12 = scmp.ge.s32.totalorder %s501_s16, 2 }
   0xf   : > { %s579_s25 = scalar_select %p39_p7, %s489_s14, %s41_s20  }
  0x10   : > { %p581_p11 = por %p112_p10, %p54_p3  ;;  %p339_p13 = scmp.lt.s32.totalorder %s501_s16, 2 }
  0x11   : > { %s139_s27 = sand.u32 1, %s489_s14   ;;  %s319_s29 = sshll.u32 %s497_s15, 3 }
  0x12   : > { %s318_s28 = sshll.u32 %s139_s27, 3  ;;  %s148_s5 = scalar_lea.hbm %s647_s1, %s319_s29 }
  0x13   : > { %s143_s6 = scalar_lea.vmem [#allocation4], %s318_s28  ;;  %s150_s8 = sshll.u32 %s148_s5, 4  ;;  %s151_s8 = int_to_ptr.hbm [resolvable:$true] %s150_s8 }
  0x14   : > { %s152_s7 = sshll.u32 %s143_s6, 4  ;;  %p332_p0 = pnand %p339_p13, %p564_p4  ;;  %s153_s7 = int_to_ptr.vmem [resolvable:$true] %s152_s7 }
  0x15   : > { %p320_p1 = scmp.ge.s32.totalorder %s501_s16, 1  ;;  %p157_p2 = scmp.lt.s32.totalorder %s501_s16, 3 }
  0x16   : > { %s140_s9 = scalar_lea.sflag [#allocation5], %s139_s27 }
  0x17   : > { %334 = dma.hbm_to_vmem [thread:$0]  (!%p332_p0), %s151_s8, 128, %s153_s7, %s140_s9  }
  0x18   : > { %p158_p3 = pnand %p320_p1, %p157_p2 }
  0x19   : > { %s597_s10 = sand.u32 (!%p158_p3), 1, %s485_s13  }
  0x1a   : > { %161 = sbr.rel (%p158_p3) target bundleno = 47 (0x2f), region = 28  ;;  %s321_s11 = sshll.u32 (!%p158_p3), %s597_s10, 3 }
  0x1b   : > { %s164_s17 = scalar_lea.sflag (!%p158_p3), [#allocation5], %s597_s10  ;;  %s167_s18 = scalar_lea.vmem (!%p158_p3), [#allocation4], %s321_s11 }
  0x1f   : > { %472 = dma.done.wait (%p570_p8), %s164_s17, 128  }
  0x20   : > { %474 = vsyncadd (%p570_p8), %s164_s17, 4294967168  ;;  %s324_s20 = sshll.u32 %s493_s0, 3  ;;  %s192_s28 = scalar_lea.vmem [#allocation7], %s321_s11  ;;  %v197_v0 = vld [vmem:[%s167_s18] sm:$0xff] }
  0x21   : > { %s213_s27 = scalar_lea.hbm %s649_s3, %s324_s20  ;;  %s215_s29 = sshll.u32 %s192_s28, 4  ;;  %v198_v1 = vld [vmem:[%s648_s2] sm:$0xff]  ;;  %s216_s29 = int_to_ptr.vmem [resolvable:$true] %s215_s29 }
  0x22   : > { %s217_s30 = sshll.u32 %s213_s27, 4  ;;  %v199_v2 = vadd.f32 %v198_v1, %v197_v0  ;;  %s202_s23 = scalar_lea.sflag [#allocation6], %s597_s10  ;;  %s218_s30 = int_to_ptr.hbm [resolvable:$true] %s217_s30 }
  0x23   : > { %s433_s6 = sshra.s32 %s218_s30, 4  ;;  %s439_s9 = scalar_lea.hbm %s649_s3, 16  ;;  %s434_s6 = int_to_ptr.hbm [resolvable:$true] %s433_s6 }
  0x24   : > { %200 = vst [vmem:[%s192_s28] sm:$0xff] %v199_v2  ;;  %s435_s0 = scalar_lea.hbm %s434_s6, 8  ;;  %p440_p7 = scmp.lt.s32.totalorder %s434_s6, %s649_s3 }
  0x25   : > { %p436_p4 = scmp.ne.s32.totalorder %s434_s6, %s435_s0  ;;  %p441_p8 = scmp.lt.s32.totalorder %s439_s9, %s435_s0 }
  0x27   : > { %p437_p5 = pnand %p436_p4, %p574_p9  ;;  %p442_p10 = por %p441_p8, %p440_p7 }
  0x29   : > { %p438_p6 = pneg %p437_p5 }
  0x2b   : > { %p443_p13 = pnand %p442_p10, %p438_p6 }
  0x2d   : > { %446 = shalt.err (!%p443_p13)
}
  0x2e   : > { %329 = dma.vmem_to_hbm [thread:$0]  (%p574_p9), %s216_s29, 128, %s218_s30, %s202_s23  }
  0x2f PF: > { %s229_s10 = sand.u32 1, %s481_s12   ;;  %p336_p0 = pnand %p317_p12, %p581_p11 }
  0x30   : > { %s230_s18 = scalar_lea.sflag [#allocation6], %s229_s10 }
  0x31   : > { %p337_p1 = pneg %p336_p0 }
  0x33   : > { %476 = dma.done.wait (%p337_p1), %s230_s18, 128  }
  0x34   : > { %478 = vsyncadd (%p337_p1), %s230_s18, 4294967168  ;;  %s20_s16 = sadd.s32 1, %s501_s16   ;;  %s654_s12 = smov %s485_s13 }
  0x35   : > { %p17_p2 = scmp.ge.s32.totalorder %s20_s16, 4   ;;  %s655_s13 = smov %s489_s14 }
  0x36   : > { %s656_s14 = smov %s579_s25  ;;  %s657_s0 = smov %s497_s15 }
  0x37   : > { %s658_s15 = smov %s660_s19  ;;  %19 = sbr.rel (!%p17_p2) target bundleno = 6 (0x6), region = 76 }
  0x3c   :  { %236 = vsyncpa [#allocation5], 1 }
  0x3d   :  { %238 = vsyncpa [#allocation5 + $0x1], 1 }
  0x3e   :  { %239 = vsyncpa [#allocation6], 1 }
  0x3f   :  { %241 = vsyncpa [#allocation6 + $0x1], 1 }

</bundles_post_ra>
